<compile_context>
chip_gen: v7x
topology: tpu7x:2x2x1
jax: 0.10.0
libtpu: 0.0.40
codegen_flags: <defaults>
</compile_context>

<pallas_src>
import functools

import jax
import jax.numpy as jnp
import numpy as np
from jax.experimental import pallas as pl
from jax.experimental.pallas import tpu as pltpu


def calculate_conv2d_outsize(h_input, w_input, padding, kernel_size, stride, dilation=1):
    h_output = (h_input + 2 * padding - dilation * (kernel_size - 1) - 1) // stride + 1
    w_output = (w_input + 2 * padding - dilation * (kernel_size - 1) - 1) // stride + 1
    return (h_output, w_output)


def _round_up(a, b):
    return ((a + b - 1) // b) * b


def _cdiv(a, b):
    return (a + b - 1) // b


def _snn_conv_kernel(membrane_filter, decay_v, reset_decay, reset_v, Tt,
                     patches_ref, w_ref, b_ref, spk_ref, v_ref, r_ref):
    """One grid step == (m-tile i, time-chunk j) covering Tt time steps.

    patches_ref: (Tt, Kdim, tm) bf16    w_ref: (C_out, Kdim) bf16
    b_ref:       (C_out, 1)     f32
    spk_ref:     (Tt, C_out, tm) bf16   v_ref / r_ref: (C_out, tm) f32 resident.
    """
    j = pl.program_id(1)

    # initial states are zeros (create_init_states equivalent)
    @pl.when(j == 0)
    def _():
        v_ref[...] = jnp.zeros_like(v_ref)
        r_ref[...] = jnp.zeros_like(r_ref)

    w = w_ref[...]            # bf16, hoisted out of the time loop
    b = b_ref[...]            # f32
    v = v_ref[...]
    r = r_ref[...]

    # Short static (unrolled) loop over the time chunk; the im2col matmuls are
    # t-independent, only the v/reset recurrence is serial.
    for t in range(Tt):
        # conv2d as im2col matmul on the native bf16 MXU path, f32 accumulation;
        # lane dim == tm -> dense (unmasked) stores.
        conv_out = jnp.dot(w, patches_ref[t],
                           preferred_element_type=jnp.float32) + b
        if membrane_filter:
            v = v * decay_v + conv_out - r
        else:
            v = conv_out - r

        # threshold.forward: max(0, sign(v - 1)) == strict (v > 1)
        spike = (v > 1.0).astype(jnp.float32)

        r = r * reset_decay + spike * reset_v
        spk_ref[t] = spike.astype(spk_ref.dtype)

    v_ref[...] = v
    r_ref[...] = r


def _im2col(x_tb, K, stride, padding):
    """x_tb: [T, B, C, H, W] -> patches [T, C*K*K, B*Hout*Wout] (M on lanes)."""
    T, B, C, H, W = x_tb.shape
    xp = jnp.pad(x_tb, ((0, 0), (0, 0), (0, 0),
                        (padding, padding), (padding, padding)))
    Hout, Wout = calculate_conv2d_outsize(H, W, padding, K, stride)
    cols = []
    for ki in range(K):
        for kj in range(K):
            cols.append(xp[:, :, :,
                           ki:ki + stride * Hout:stride,
                           kj:kj + stride * Wout:stride])     # [T,B,C,Hout,Wout]
    cols = jnp.stack(cols, axis=3)                            # [T,B,C,K*K,Ho,Wo]
    cols = cols.reshape(T, B, C * K * K, Hout * Wout)         # col = c*K*K+ki*K+kj
    cols = cols.transpose(0, 2, 1, 3)                         # [T,Kdim,B,Ho*Wo]
    return cols.reshape(T, C * K * K, B * Hout * Wout), Hout, Wout


def _pick_time_chunk(T, Kdim, C_out, tm_eff, budget_bytes=24 * 1024 * 1024):
    """Largest divisor of T (<= 16) whose streamed working set fits the budget."""
    best = 1
    for tt in range(1, min(T, 16) + 1):
        if T % tt:
            continue
        est = (3 * tt * _round_up(Kdim, 16) * tm_eff * 2      # patches (<=3 bufs)
               + 2 * tt * _round_up(C_out, 16) * tm_eff * 2)  # spikes
        if est <= budget_bytes:
            best = tt
    return best


def conv2d_layer_forward(x, weight, bias, tau_m, stride, padding, membrane_filter,
                         *, tm=1024, patches_dtype=jnp.bfloat16):
    """x: [B, C_in, H, W, T]. Returns (spikes [B,C_out,Hout,Wout,T], (v, reset))."""
    B, C_in, H, W, T = x.shape
    C_out, _, K, _ = weight.shape

    x_tb = jnp.transpose(x, (4, 0, 1, 2, 3)).astype(jnp.float32)
    patches, Hout, Wout = _im2col(x_tb, K, stride, padding)    # [T, Kdim, M] f32
    M = B * Hout * Wout
    Kdim = C_in * K * K

    # --- M (lane) tiling: multiples of 128 lanes; cap so the "parallel" axis
    # has >= 2 tiles whenever M allows it (v7x dual-TC megacore sharding).
    tm = _round_up(max(tm, 128), 128)
    half_m = _round_up(_cdiv(M, 2), 128)
    tm_eff = max(128, min(tm, half_m))
    M_pad = _round_up(M, tm_eff)

    # --- time chunking (amortize grid-step overhead, lengthen DMA bursts)
    Tt = _pick_time_chunk(T, Kdim, C_out, tm_eff)

    patches = jnp.pad(patches, ((0, 0), (0, 0), (0, M_pad - M)))
    # bf16 is lossless for 0/1 spike inputs; pass patches_dtype=f32 for analog inputs.
    patches = patches.astype(patches_dtype)

    w_mat = weight.reshape(C_out, Kdim).astype(jnp.bfloat16)   # native MXU bf16 path
    b_col = bias.reshape(C_out, 1).astype(jnp.float32)

    decay = float(np.exp(-1.0 / tau_m))
    # decay_v, reset_decay, reset_v are constant-filled parameters in the module.
    kernel = functools.partial(_snn_conv_kernel, membrane_filter, decay, decay, 1.0, Tt)

    n_m_tiles = M_pad // tm_eff
    n_t_chunks = T // Tt

    # Deeper patches pipeline only when there are enough grid steps to exploit it.
    patches_idx = lambda i, j: (j, 0, i)
    n_patch_bufs = 2
    patches_spec = pl.BlockSpec((Tt, Kdim, tm_eff), patches_idx)
    if n_m_tiles * n_t_chunks >= 4:
        try:
            patches_spec = pl.BlockSpec((Tt, Kdim, tm_eff), patches_idx,
                                        pipeline_mode=pl.Buffered(3))
            n_patch_bufs = 3
        except TypeError:
            pass  # older jax without pipeline_mode on BlockSpec

    # VMEM budget (buffered streams + resident state) with headroom, capped for
    # the 64 MiB/TC v7x ceiling.
    est = (n_patch_bufs * Tt * _round_up(Kdim, 16) * tm_eff * 2       # patches bf16
           + 2 * Tt * _round_up(C_out, 16) * tm_eff * 2               # spikes  bf16
           + 2 * 2 * _round_up(C_out, 8) * tm_eff * 4                 # v, reset f32
           + 2 * _round_up(C_out, 16) * _round_up(Kdim, 128) * 2      # weight bf16
           + (1 << 16))
    vmem_limit = int(min(40 * 1024 * 1024, max(16 * 1024 * 1024, 4 * est)))

    spk, v_fin, r_fin = pl.pallas_call(
        kernel,
        out_shape=(jax.ShapeDtypeStruct((T, C_out, M_pad), jnp.bfloat16),
                   jax.ShapeDtypeStruct((C_out, M_pad), jnp.float32),
                   jax.ShapeDtypeStruct((C_out, M_pad), jnp.float32)),
        grid_spec=pltpu.PrefetchScalarGridSpec(
            num_scalar_prefetch=0,
            grid=(n_m_tiles, n_t_chunks),
            in_specs=[
                patches_spec,                                           # patches
                pl.BlockSpec((C_out, Kdim), lambda i, j: (0, 0)),       # weight
                pl.BlockSpec((C_out, 1), lambda i, j: (0, 0)),          # bias
            ],
            out_specs=(
                pl.BlockSpec((Tt, C_out, tm_eff), lambda i, j: (j, 0, i)),  # spikes
                pl.BlockSpec((C_out, tm_eff), lambda i, j: (0, i)),         # resident v
                pl.BlockSpec((C_out, tm_eff), lambda i, j: (0, i)),         # resident reset
            ),
        ),
        compiler_params=pltpu.CompilerParams(
            dimension_semantics=("parallel", "arbitrary"),   # M-tiles parallel, T recurrent
            vmem_limit_bytes=vmem_limit),
    )(patches, w_mat, b_col)

    # Back to PyTorch NCHW(+T) conventions; stay bf16 through the transpose,
    # cast to f32 only at the very end.
    spikes = (spk[:, :, :M].reshape(T, C_out, B, Hout, Wout)
              .transpose(2, 1, 3, 4, 0).astype(jnp.float32))
    v_out = v_fin[:, :M].reshape(C_out, B, Hout, Wout).transpose(1, 0, 2, 3)
    r_out = r_fin[:, :M].reshape(C_out, B, Hout, Wout).transpose(1, 0, 2, 3)
    return spikes, (v_out, r_out)


def _reference_forward(x, weight, bias, tau_m, stride, padding, membrane_filter):
    """Pure-JAX reference (same im2col / bf16-operand formulation) for validation."""
    B, C_in, H, W, T = x.shape
    C_out, _, K, _ = weight.shape
    x_tb = jnp.transpose(x, (4, 0, 1, 2, 3)).astype(jnp.float32)
    patches, Hout, Wout = _im2col(x_tb, K, stride, padding)    # [T, Kdim, M] f32
    patches = patches.astype(jnp.bfloat16)
    w_mat = weight.reshape(C_out, C_in * K * K).astype(jnp.bfloat16)
    b_col = bias.reshape(C_out, 1).astype(jnp.float32)
    decay = float(np.exp(-1.0 / tau_m))

    M = B * Hout * Wout
    v = jnp.zeros((C_out, M), jnp.float32)
    r = jnp.zeros((C_out, M), jnp.float32)
    spikes = []
    for t in range(T):
        conv_out = jnp.dot(w_mat, patches[t], preferred_element_type=jnp.float32) + b_col
        cur_v = v * decay + conv_out - r if membrane_filter else conv_out - r
        spike = (cur_v > 1.0).astype(jnp.float32)
        r = r * decay + spike * 1.0
        v = cur_v
        spikes.append(spike)
    spk = jnp.stack(spikes, 0).reshape(T, C_out, B, Hout, Wout).transpose(2, 1, 3, 4, 0)
    v_out = v.reshape(C_out, B, Hout, Wout).transpose(1, 0, 2, 3)
    r_out = r.reshape(C_out, B, Hout, Wout).transpose(1, 0, 2, 3)
    return spk, (v_out, r_out)


if __name__ == "__main__":
    # small, module-consistent shapes
    B, C_in, C_out = 2, 4, 8
    H = W = 16
    K, stride, padding = 3, 1, 1
    T = 8
    tau_m = 4.0
    train_bias = True
    membrane_filter = True

    key = jax.random.PRNGKey(0)
    k1, k2, k3 = jax.random.split(key, 3)

    # deterministic "spike" inputs [B, C_in, H, W, T]
    x = (jax.random.uniform(k1, (B, C_in, H, W, T)) < 0.5).astype(jnp.float32)

    # deterministic parameter init (Conv2d-like uniform bound)
    fan_in = C_in * K * K
    bound = 1.0 / float(np.sqrt(fan_in))
    weight = jax.random.uniform(k2, (C_out, C_in, K, K), jnp.float32,
                                minval=-bound, maxval=bound)
    if train_bias:
        bias = jax.random.uniform(k3, (C_out,), jnp.float32, minval=-bound, maxval=bound)
    else:
        bias = jnp.zeros((C_out,), jnp.float32)

    spikes, (v_fin, r_fin) = conv2d_layer_forward(
        x, weight, bias, tau_m, stride, padding, membrane_filter)
    jax.block_until_ready((spikes, v_fin, r_fin))

    # correctness check against a pure-JAX reference (same bf16-operand matmul)
    spikes_ref, (v_ref, r_ref) = _reference_forward(
        x, weight, bias, tau_m, stride, padding, membrane_filter)

    spikes_np = np.asarray(spikes)
    spikes_ref_np = np.asarray(spikes_ref)
    mismatch_frac = float(np.mean(spikes_np != spikes_ref_np))
    # tolerate only isolated near-threshold flips (expected: exactly 0)
    assert mismatch_frac < 1e-3, f"spike mismatch fraction {mismatch_frac}"
    np.testing.assert_allclose(np.asarray(v_fin), np.asarray(v_ref),
                               rtol=2e-3, atol=2e-3)
    np.testing.assert_allclose(np.asarray(r_fin), np.asarray(r_ref),
                               rtol=2e-3, atol=2e-3)

    Hout, Wout = calculate_conv2d_outsize(H, W, padding, K, stride)
    assert spikes.shape == (B, C_out, Hout, Wout, T)
    print("KERNEL_OK")
</pallas_src>

<mosaic_0001>
module attributes {stable_mosaic.version = 11 : i64} {
  func.func @_snn_conv_kernel(%arg0: i32, %arg1: i32, %arg2: memref<8x36x256xbf16, #tpu.memory_space<vmem>>, %arg3: memref<8x36xbf16, #tpu.memory_space<vmem>>, %arg4: memref<8x1xf32, #tpu.memory_space<vmem>>, %arg5: memref<8x8x256xbf16, #tpu.memory_space<vmem>>, %arg6: memref<8x256xf32, #tpu.memory_space<vmem>>, %arg7: memref<8x256xf32, #tpu.memory_space<vmem>>) attributes {dimension_semantics = [#tpu.dimension_semantics<parallel>, #tpu.dimension_semantics<arbitrary>], iteration_bounds = array<i64: 2, 1>, scalar_prefetch = 0 : i64, scratch_operands = 0 : i64, tpu.core_type = #tpu.core_type<tc>, window_params = [{transform_indices = @transform_0, window_bounds = array<i64: 8, 36, 256>}, {pipeline_mode = #tpu.pipeline_mode<synchronous>, transform_indices = @transform_1, window_bounds = array<i64: 8, 36>}, {pipeline_mode = #tpu.pipeline_mode<synchronous>, transform_indices = @transform_2, window_bounds = array<i64: 8, 1>}, {transform_indices = @transform_3, window_bounds = array<i64: 8, 8, 256>}, {transform_indices = @transform_4, window_bounds = array<i64: 8, 256>}, {transform_indices = @transform_5, window_bounds = array<i64: 8, 256>}]} {
    %c0_i32 = arith.constant 0 : i32
    %0 = arith.cmpi eq, %arg1, %c0_i32 : i32
    %1 = arith.extui %0 : i1 to i32
    %c0_i32_0 = arith.constant 0 : i32
    %2 = arith.cmpi ne, %1, %c0_i32_0 : i32
    scf.if %2 {
      %cst_92 = arith.constant 0.000000e+00 : f32
      %185 = vector.broadcast %cst_92 : f32 to vector<8x256xf32>
      %c0_93 = arith.constant 0 : index
      %c0_94 = arith.constant 0 : index
      %186 = vector.load %arg6[%c0_93, %c0_94] : memref<8x256xf32, #tpu.memory_space<vmem>>, vector<8x256xf32>
      tpu.vector_store %arg6[%c0_93, %c0_94], %185 {strides = array<i32>} : memref<8x256xf32, #tpu.memory_space<vmem>>, vector<8x256xf32>,
      %cst_95 = arith.constant 0.000000e+00 : f32
      %187 = vector.broadcast %cst_95 : f32 to vector<8x256xf32>
      %c0_96 = arith.constant 0 : index
      %c0_97 = arith.constant 0 : index
      %188 = vector.load %arg7[%c0_96, %c0_97] : memref<8x256xf32, #tpu.memory_space<vmem>>, vector<8x256xf32>
      tpu.vector_store %arg7[%c0_96, %c0_97], %187 {strides = array<i32>} : memref<8x256xf32, #tpu.memory_space<vmem>>, vector<8x256xf32>,
    } else {
    }
    %c0 = arith.constant 0 : index
    %c0_1 = arith.constant 0 : index
    %3 = vector.load %arg3[%c0, %c0_1] : memref<8x36xbf16, #tpu.memory_space<vmem>>, vector<8x36xbf16>
    %c0_2 = arith.constant 0 : index
    %c0_3 = arith.constant 0 : index
    %4 = vector.load %arg4[%c0_2, %c0_3] : memref<8x1xf32, #tpu.memory_space<vmem>>, vector<8x1xf32>
    %c0_4 = arith.constant 0 : index
    %c0_5 = arith.constant 0 : index
    %5 = vector.load %arg6[%c0_4, %c0_5] : memref<8x256xf32, #tpu.memory_space<vmem>>, vector<8x256xf32>
    %c0_6 = arith.constant 0 : index
    %c0_7 = arith.constant 0 : index
    %6 = vector.load %arg7[%c0_6, %c0_7] : memref<8x256xf32, #tpu.memory_space<vmem>>, vector<8x256xf32>
    %c0_8 = arith.constant 0 : index
    %c0_9 = arith.constant 0 : index
    %c0_10 = arith.constant 0 : index
    %7 = vector.load %arg2[%c0_8, %c0_9, %c0_10] : memref<8x36x256xbf16, #tpu.memory_space<vmem>>, vector<1x36x256xbf16>
    %8 = vector.shape_cast %7 : vector<1x36x256xbf16> to vector<36x256xbf16>
    %cst = arith.constant dense<0.000000e+00> : vector<8x256xf32>
    %9 = tpu.matmul %3, %8, %cst {dimension_numbers = #tpu.dot_dimension_numbers<[1], [0], [0], [1], [0, 0, 1, 1], [], []>} : vector<8x36xbf16>, vector<36x256xbf16>, vector<8x256xf32> -> vector<8x256xf32>
    %10 = vector.broadcast %4 : vector<8x1xf32> to vector<8x256xf32>
    %11 = arith.addf %9, %10 : vector<8x256xf32>
    %cst_11 = arith.constant 0.778800785 : f32
    %12 = vector.broadcast %cst_11 : f32 to vector<8x256xf32>
    %13 = arith.mulf %5, %12 : vector<8x256xf32>
    %14 = arith.addf %13, %11 : vector<8x256xf32>
    %15 = arith.subf %14, %6 : vector<8x256xf32>
    %cst_12 = arith.constant 1.000000e+00 : f32
    %16 = vector.broadcast %cst_12 : f32 to vector<8x256xf32>
    %17 = arith.cmpf ogt, %15, %16 : vector<8x256xf32>
    %18 = arith.extui %17 : vector<8x256xi1> to vector<8x256xi32>
    %19 = arith.sitofp %18 : vector<8x256xi32> to vector<8x256xf32>
    %cst_13 = arith.constant 0.778800785 : f32
    %20 = vector.broadcast %cst_13 : f32 to vector<8x256xf32>
    %21 = arith.mulf %6, %20 : vector<8x256xf32>
    %cst_14 = arith.constant 1.000000e+00 : f32
    %22 = vector.broadcast %cst_14 : f32 to vector<8x256xf32>
    %23 = arith.mulf %19, %22 : vector<8x256xf32>
    %24 = arith.addf %21, %23 : vector<8x256xf32>
    %25 = arith.truncf %19 : vector<8x256xf32> to vector<8x256xbf16>
    %c0_15 = arith.constant 0 : index
    %c0_16 = arith.constant 0 : index
    %c0_17 = arith.constant 0 : index
    %26 = vector.load %arg5[%c0_15, %c0_16, %c0_17] : memref<8x8x256xbf16, #tpu.memory_space<vmem>>, vector<1x8x256xbf16>
    %27 = vector.shape_cast %26 : vector<1x8x256xbf16> to vector<8x256xbf16>
    %28 = vector.shape_cast %25 : vector<8x256xbf16> to vector<1x8x256xbf16>
    tpu.vector_store %arg5[%c0_15, %c0_16, %c0_17], %28 {strides = array<i32>} : memref<8x8x256xbf16, #tpu.memory_space<vmem>>, vector<1x8x256xbf16>,
    %c1 = arith.constant 1 : index
    %c0_18 = arith.constant 0 : index
    %c0_19 = arith.constant 0 : index
    %29 = vector.load %arg2[%c1, %c0_18, %c0_19] : memref<8x36x256xbf16, #tpu.memory_space<vmem>>, vector<1x36x256xbf16>
    %30 = vector.shape_cast %29 : vector<1x36x256xbf16> to vector<36x256xbf16>
    %cst_20 = arith.constant dense<0.000000e+00> : vector<8x256xf32>
    %31 = tpu.matmul %3, %30, %cst_20 {dimension_numbers = #tpu.dot_dimension_numbers<[1], [0], [0], [1], [0, 0, 1, 1], [], []>} : vector<8x36xbf16>, vector<36x256xbf16>, vector<8x256xf32> -> vector<8x256xf32>
    %32 = vector.broadcast %4 : vector<8x1xf32> to vector<8x256xf32>
    %33 = arith.addf %31, %32 : vector<8x256xf32>
    %cst_21 = arith.constant 0.778800785 : f32
    %34 = vector.broadcast %cst_21 : f32 to vector<8x256xf32>
    %35 = arith.mulf %15, %34 : vector<8x256xf32>
    %36 = arith.addf %35, %33 : vector<8x256xf32>
    %37 = arith.subf %36, %24 : vector<8x256xf32>
    %cst_22 = arith.constant 1.000000e+00 : f32
    %38 = vector.broadcast %cst_22 : f32 to vector<8x256xf32>
    %39 = arith.cmpf ogt, %37, %38 : vector<8x256xf32>
    %40 = arith.extui %39 : vector<8x256xi1> to vector<8x256xi32>
    %41 = arith.sitofp %40 : vector<8x256xi32> to vector<8x256xf32>
    %cst_23 = arith.constant 0.778800785 : f32
    %42 = vector.broadcast %cst_23 : f32 to vector<8x256xf32>
    %43 = arith.mulf %24, %42 : vector<8x256xf32>
    %cst_24 = arith.constant 1.000000e+00 : f32
    %44 = vector.broadcast %cst_24 : f32 to vector<8x256xf32>
    %45 = arith.mulf %41, %44 : vector<8x256xf32>
    %46 = arith.addf %43, %45 : vector<8x256xf32>
    %47 = arith.truncf %41 : vector<8x256xf32> to vector<8x256xbf16>
    %c1_25 = arith.constant 1 : index
    %c0_26 = arith.constant 0 : index
    %c0_27 = arith.constant 0 : index
    %48 = vector.load %arg5[%c1_25, %c0_26, %c0_27] : memref<8x8x256xbf16, #tpu.memory_space<vmem>>, vector<1x8x256xbf16>
    %49 = vector.shape_cast %48 : vector<1x8x256xbf16> to vector<8x256xbf16>
    %50 = vector.shape_cast %47 : vector<8x256xbf16> to vector<1x8x256xbf16>
    tpu.vector_store %arg5[%c1_25, %c0_26, %c0_27], %50 {strides = array<i32>} : memref<8x8x256xbf16, #tpu.memory_space<vmem>>, vector<1x8x256xbf16>,
    %c2 = arith.constant 2 : index
    %c0_28 = arith.constant 0 : index
    %c0_29 = arith.constant 0 : index
    %51 = vector.load %arg2[%c2, %c0_28, %c0_29] : memref<8x36x256xbf16, #tpu.memory_space<vmem>>, vector<1x36x256xbf16>
    %52 = vector.shape_cast %51 : vector<1x36x256xbf16> to vector<36x256xbf16>
    %cst_30 = arith.constant dense<0.000000e+00> : vector<8x256xf32>
    %53 = tpu.matmul %3, %52, %cst_30 {dimension_numbers = #tpu.dot_dimension_numbers<[1], [0], [0], [1], [0, 0, 1, 1], [], []>} : vector<8x36xbf16>, vector<36x256xbf16>, vector<8x256xf32> -> vector<8x256xf32>
    %54 = vector.broadcast %4 : vector<8x1xf32> to vector<8x256xf32>
    %55 = arith.addf %53, %54 : vector<8x256xf32>
    %cst_31 = arith.constant 0.778800785 : f32
    %56 = vector.broadcast %cst_31 : f32 to vector<8x256xf32>
    %57 = arith.mulf %37, %56 : vector<8x256xf32>
    %58 = arith.addf %57, %55 : vector<8x256xf32>
    %59 = arith.subf %58, %46 : vector<8x256xf32>
    %cst_32 = arith.constant 1.000000e+00 : f32
    %60 = vector.broadcast %cst_32 : f32 to vector<8x256xf32>
    %61 = arith.cmpf ogt, %59, %60 : vector<8x256xf32>
    %62 = arith.extui %61 : vector<8x256xi1> to vector<8x256xi32>
    %63 = arith.sitofp %62 : vector<8x256xi32> to vector<8x256xf32>
    %cst_33 = arith.constant 0.778800785 : f32
    %64 = vector.broadcast %cst_33 : f32 to vector<8x256xf32>
    %65 = arith.mulf %46, %64 : vector<8x256xf32>
    %cst_34 = arith.constant 1.000000e+00 : f32
    %66 = vector.broadcast %cst_34 : f32 to vector<8x256xf32>
    %67 = arith.mulf %63, %66 : vector<8x256xf32>
    %68 = arith.addf %65, %67 : vector<8x256xf32>
    %69 = arith.truncf %63 : vector<8x256xf32> to vector<8x256xbf16>
    %c2_35 = arith.constant 2 : index
    %c0_36 = arith.constant 0 : index
    %c0_37 = arith.constant 0 : index
    %70 = vector.load %arg5[%c2_35, %c0_36, %c0_37] : memref<8x8x256xbf16, #tpu.memory_space<vmem>>, vector<1x8x256xbf16>
    %71 = vector.shape_cast %70 : vector<1x8x256xbf16> to vector<8x256xbf16>
    %72 = vector.shape_cast %69 : vector<8x256xbf16> to vector<1x8x256xbf16>
    tpu.vector_store %arg5[%c2_35, %c0_36, %c0_37], %72 {strides = array<i32>} : memref<8x8x256xbf16, #tpu.memory_space<vmem>>, vector<1x8x256xbf16>,
    %c3 = arith.constant 3 : index
    %c0_38 = arith.constant 0 : index
    %c0_39 = arith.constant 0 : index
    %73 = vector.load %arg2[%c3, %c0_38, %c0_39] : memref<8x36x256xbf16, #tpu.memory_space<vmem>>, vector<1x36x256xbf16>
    %74 = vector.shape_cast %73 : vector<1x36x256xbf16> to vector<36x256xbf16>
    %cst_40 = arith.constant dense<0.000000e+00> : vector<8x256xf32>
    %75 = tpu.matmul %3, %74, %cst_40 {dimension_numbers = #tpu.dot_dimension_numbers<[1], [0], [0], [1], [0, 0, 1, 1], [], []>} : vector<8x36xbf16>, vector<36x256xbf16>, vector<8x256xf32> -> vector<8x256xf32>
    %76 = vector.broadcast %4 : vector<8x1xf32> to vector<8x256xf32>
    %77 = arith.addf %75, %76 : vector<8x256xf32>
    %cst_41 = arith.constant 0.778800785 : f32
    %78 = vector.broadcast %cst_41 : f32 to vector<8x256xf32>
    %79 = arith.mulf %59, %78 : vector<8x256xf32>
    %80 = arith.addf %79, %77 : vector<8x256xf32>
    %81 = arith.subf %80, %68 : vector<8x256xf32>
    %cst_42 = arith.constant 1.000000e+00 : f32
    %82 = vector.broadcast %cst_42 : f32 to vector<8x256xf32>
    %83 = arith.cmpf ogt, %81, %82 : vector<8x256xf32>
    %84 = arith.extui %83 : vector<8x256xi1> to vector<8x256xi32>
    %85 = arith.sitofp %84 : vector<8x256xi32> to vector<8x256xf32>
    %cst_43 = arith.constant 0.778800785 : f32
    %86 = vector.broadcast %cst_43 : f32 to vector<8x256xf32>
    %87 = arith.mulf %68, %86 : vector<8x256xf32>
    %cst_44 = arith.constant 1.000000e+00 : f32
    %88 = vector.broadcast %cst_44 : f32 to vector<8x256xf32>
    %89 = arith.mulf %85, %88 : vector<8x256xf32>
    %90 = arith.addf %87, %89 : vector<8x256xf32>
    %91 = arith.truncf %85 : vector<8x256xf32> to vector<8x256xbf16>
    %c3_45 = arith.constant 3 : index
    %c0_46 = arith.constant 0 : index
    %c0_47 = arith.constant 0 : index
    %92 = vector.load %arg5[%c3_45, %c0_46, %c0_47] : memref<8x8x256xbf16, #tpu.memory_space<vmem>>, vector<1x8x256xbf16>
    %93 = vector.shape_cast %92 : vector<1x8x256xbf16> to vector<8x256xbf16>
    %94 = vector.shape_cast %91 : vector<8x256xbf16> to vector<1x8x256xbf16>
    tpu.vector_store %arg5[%c3_45, %c0_46, %c0_47], %94 {strides = array<i32>} : memref<8x8x256xbf16, #tpu.memory_space<vmem>>, vector<1x8x256xbf16>,
    %c4 = arith.constant 4 : index
    %c0_48 = arith.constant 0 : index
    %c0_49 = arith.constant 0 : index
    %95 = vector.load %arg2[%c4, %c0_48, %c0_49] : memref<8x36x256xbf16, #tpu.memory_space<vmem>>, vector<1x36x256xbf16>
    %96 = vector.shape_cast %95 : vector<1x36x256xbf16> to vector<36x256xbf16>
    %cst_50 = arith.constant dense<0.000000e+00> : vector<8x256xf32>
    %97 = tpu.matmul %3, %96, %cst_50 {dimension_numbers = #tpu.dot_dimension_numbers<[1], [0], [0], [1], [0, 0, 1, 1], [], []>} : vector<8x36xbf16>, vector<36x256xbf16>, vector<8x256xf32> -> vector<8x256xf32>
    %98 = vector.broadcast %4 : vector<8x1xf32> to vector<8x256xf32>
    %99 = arith.addf %97, %98 : vector<8x256xf32>
    %cst_51 = arith.constant 0.778800785 : f32
    %100 = vector.broadcast %cst_51 : f32 to vector<8x256xf32>
    %101 = arith.mulf %81, %100 : vector<8x256xf32>
    %102 = arith.addf %101, %99 : vector<8x256xf32>
    %103 = arith.subf %102, %90 : vector<8x256xf32>
    %cst_52 = arith.constant 1.000000e+00 : f32
    %104 = vector.broadcast %cst_52 : f32 to vector<8x256xf32>
    %105 = arith.cmpf ogt, %103, %104 : vector<8x256xf32>
    %106 = arith.extui %105 : vector<8x256xi1> to vector<8x256xi32>
    %107 = arith.sitofp %106 : vector<8x256xi32> to vector<8x256xf32>
    %cst_53 = arith.constant 0.778800785 : f32
    %108 = vector.broadcast %cst_53 : f32 to vector<8x256xf32>
    %109 = arith.mulf %90, %108 : vector<8x256xf32>
    %cst_54 = arith.constant 1.000000e+00 : f32
    %110 = vector.broadcast %cst_54 : f32 to vector<8x256xf32>
    %111 = arith.mulf %107, %110 : vector<8x256xf32>
    %112 = arith.addf %109, %111 : vector<8x256xf32>
    %113 = arith.truncf %107 : vector<8x256xf32> to vector<8x256xbf16>
    %c4_55 = arith.constant 4 : index
    %c0_56 = arith.constant 0 : index
    %c0_57 = arith.constant 0 : index
    %114 = vector.load %arg5[%c4_55, %c0_56, %c0_57] : memref<8x8x256xbf16, #tpu.memory_space<vmem>>, vector<1x8x256xbf16>
    %115 = vector.shape_cast %114 : vector<1x8x256xbf16> to vector<8x256xbf16>
    %116 = vector.shape_cast %113 : vector<8x256xbf16> to vector<1x8x256xbf16>
    tpu.vector_store %arg5[%c4_55, %c0_56, %c0_57], %116 {strides = array<i32>} : memref<8x8x256xbf16, #tpu.memory_space<vmem>>, vector<1x8x256xbf16>,
    %c5 = arith.constant 5 : index
    %c0_58 = arith.constant 0 : index
    %c0_59 = arith.constant 0 : index
    %117 = vector.load %arg2[%c5, %c0_58, %c0_59] : memref<8x36x256xbf16, #tpu.memory_space<vmem>>, vector<1x36x256xbf16>
    %118 = vector.shape_cast %117 : vector<1x36x256xbf16> to vector<36x256xbf16>
    %cst_60 = arith.constant dense<0.000000e+00> : vector<8x256xf32>
    %119 = tpu.matmul %3, %118, %cst_60 {dimension_numbers = #tpu.dot_dimension_numbers<[1], [0], [0], [1], [0, 0, 1, 1], [], []>} : vector<8x36xbf16>, vector<36x256xbf16>, vector<8x256xf32> -> vector<8x256xf32>
    %120 = vector.broadcast %4 : vector<8x1xf32> to vector<8x256xf32>
    %121 = arith.addf %119, %120 : vector<8x256xf32>
    %cst_61 = arith.constant 0.778800785 : f32
    %122 = vector.broadcast %cst_61 : f32 to vector<8x256xf32>
    %123 = arith.mulf %103, %122 : vector<8x256xf32>
    %124 = arith.addf %123, %121 : vector<8x256xf32>
    %125 = arith.subf %124, %112 : vector<8x256xf32>
    %cst_62 = arith.constant 1.000000e+00 : f32
    %126 = vector.broadcast %cst_62 : f32 to vector<8x256xf32>
    %127 = arith.cmpf ogt, %125, %126 : vector<8x256xf32>
    %128 = arith.extui %127 : vector<8x256xi1> to vector<8x256xi32>
    %129 = arith.sitofp %128 : vector<8x256xi32> to vector<8x256xf32>
    %cst_63 = arith.constant 0.778800785 : f32
    %130 = vector.broadcast %cst_63 : f32 to vector<8x256xf32>
    %131 = arith.mulf %112, %130 : vector<8x256xf32>
    %cst_64 = arith.constant 1.000000e+00 : f32
    %132 = vector.broadcast %cst_64 : f32 to vector<8x256xf32>
    %133 = arith.mulf %129, %132 : vector<8x256xf32>
    %134 = arith.addf %131, %133 : vector<8x256xf32>
    %135 = arith.truncf %129 : vector<8x256xf32> to vector<8x256xbf16>
    %c5_65 = arith.constant 5 : index
    %c0_66 = arith.constant 0 : index
    %c0_67 = arith.constant 0 : index
    %136 = vector.load %arg5[%c5_65, %c0_66, %c0_67] : memref<8x8x256xbf16, #tpu.memory_space<vmem>>, vector<1x8x256xbf16>
    %137 = vector.shape_cast %136 : vector<1x8x256xbf16> to vector<8x256xbf16>
    %138 = vector.shape_cast %135 : vector<8x256xbf16> to vector<1x8x256xbf16>
    tpu.vector_store %arg5[%c5_65, %c0_66, %c0_67], %138 {strides = array<i32>} : memref<8x8x256xbf16, #tpu.memory_space<vmem>>, vector<1x8x256xbf16>,
    %c6 = arith.constant 6 : index
    %c0_68 = arith.constant 0 : index
    %c0_69 = arith.constant 0 : index
    %139 = vector.load %arg2[%c6, %c0_68, %c0_69] : memref<8x36x256xbf16, #tpu.memory_space<vmem>>, vector<1x36x256xbf16>
    %140 = vector.shape_cast %139 : vector<1x36x256xbf16> to vector<36x256xbf16>
    %cst_70 = arith.constant dense<0.000000e+00> : vector<8x256xf32>
    %141 = tpu.matmul %3, %140, %cst_70 {dimension_numbers = #tpu.dot_dimension_numbers<[1], [0], [0], [1], [0, 0, 1, 1], [], []>} : vector<8x36xbf16>, vector<36x256xbf16>, vector<8x256xf32> -> vector<8x256xf32>
    %142 = vector.broadcast %4 : vector<8x1xf32> to vector<8x256xf32>
    %143 = arith.addf %141, %142 : vector<8x256xf32>
    %cst_71 = arith.constant 0.778800785 : f32
    %144 = vector.broadcast %cst_71 : f32 to vector<8x256xf32>
    %145 = arith.mulf %125, %144 : vector<8x256xf32>
    %146 = arith.addf %145, %143 : vector<8x256xf32>
    %147 = arith.subf %146, %134 : vector<8x256xf32>
    %cst_72 = arith.constant 1.000000e+00 : f32
    %148 = vector.broadcast %cst_72 : f32 to vector<8x256xf32>
    %149 = arith.cmpf ogt, %147, %148 : vector<8x256xf32>
    %150 = arith.extui %149 : vector<8x256xi1> to vector<8x256xi32>
    %151 = arith.sitofp %150 : vector<8x256xi32> to vector<8x256xf32>
    %cst_73 = arith.constant 0.778800785 : f32
    %152 = vector.broadcast %cst_73 : f32 to vector<8x256xf32>
    %153 = arith.mulf %134, %152 : vector<8x256xf32>
    %cst_74 = arith.constant 1.000000e+00 : f32
    %154 = vector.broadcast %cst_74 : f32 to vector<8x256xf32>
    %155 = arith.mulf %151, %154 : vector<8x256xf32>
    %156 = arith.addf %153, %155 : vector<8x256xf32>
    %157 = arith.truncf %151 : vector<8x256xf32> to vector<8x256xbf16>
    %c6_75 = arith.constant 6 : index
    %c0_76 = arith.constant 0 : index
    %c0_77 = arith.constant 0 : index
    %158 = vector.load %arg5[%c6_75, %c0_76, %c0_77] : memref<8x8x256xbf16, #tpu.memory_space<vmem>>, vector<1x8x256xbf16>
    %159 = vector.shape_cast %158 : vector<1x8x256xbf16> to vector<8x256xbf16>
    %160 = vector.shape_cast %157 : vector<8x256xbf16> to vector<1x8x256xbf16>
    tpu.vector_store %arg5[%c6_75, %c0_76, %c0_77], %160 {strides = array<i32>} : memref<8x8x256xbf16, #tpu.memory_space<vmem>>, vector<1x8x256xbf16>,
    %c7 = arith.constant 7 : index
    %c0_78 = arith.constant 0 : index
    %c0_79 = arith.constant 0 : index
    %161 = vector.load %arg2[%c7, %c0_78, %c0_79] : memref<8x36x256xbf16, #tpu.memory_space<vmem>>, vector<1x36x256xbf16>
    %162 = vector.shape_cast %161 : vector<1x36x256xbf16> to vector<36x256xbf16>
    %cst_80 = arith.constant dense<0.000000e+00> : vector<8x256xf32>
    %163 = tpu.matmul %3, %162, %cst_80 {dimension_numbers = #tpu.dot_dimension_numbers<[1], [0], [0], [1], [0, 0, 1, 1], [], []>} : vector<8x36xbf16>, vector<36x256xbf16>, vector<8x256xf32> -> vector<8x256xf32>
    %164 = vector.broadcast %4 : vector<8x1xf32> to vector<8x256xf32>
    %165 = arith.addf %163, %164 : vector<8x256xf32>
    %cst_81 = arith.constant 0.778800785 : f32
    %166 = vector.broadcast %cst_81 : f32 to vector<8x256xf32>
    %167 = arith.mulf %147, %166 : vector<8x256xf32>
    %168 = arith.addf %167, %165 : vector<8x256xf32>
    %169 = arith.subf %168, %156 : vector<8x256xf32>
    %cst_82 = arith.constant 1.000000e+00 : f32
    %170 = vector.broadcast %cst_82 : f32 to vector<8x256xf32>
    %171 = arith.cmpf ogt, %169, %170 : vector<8x256xf32>
    %172 = arith.extui %171 : vector<8x256xi1> to vector<8x256xi32>
    %173 = arith.sitofp %172 : vector<8x256xi32> to vector<8x256xf32>
    %cst_83 = arith.constant 0.778800785 : f32
    %174 = vector.broadcast %cst_83 : f32 to vector<8x256xf32>
    %175 = arith.mulf %156, %174 : vector<8x256xf32>
    %cst_84 = arith.constant 1.000000e+00 : f32
    %176 = vector.broadcast %cst_84 : f32 to vector<8x256xf32>
    %177 = arith.mulf %173, %176 : vector<8x256xf32>
    %178 = arith.addf %175, %177 : vector<8x256xf32>
    %179 = arith.truncf %173 : vector<8x256xf32> to vector<8x256xbf16>
    %c7_85 = arith.constant 7 : index
    %c0_86 = arith.constant 0 : index
    %c0_87 = arith.constant 0 : index
    %180 = vector.load %arg5[%c7_85, %c0_86, %c0_87] : memref<8x8x256xbf16, #tpu.memory_space<vmem>>, vector<1x8x256xbf16>
    %181 = vector.shape_cast %180 : vector<1x8x256xbf16> to vector<8x256xbf16>
    %182 = vector.shape_cast %179 : vector<8x256xbf16> to vector<1x8x256xbf16>
    tpu.vector_store %arg5[%c7_85, %c0_86, %c0_87], %182 {strides = array<i32>} : memref<8x8x256xbf16, #tpu.memory_space<vmem>>, vector<1x8x256xbf16>,
    %c0_88 = arith.constant 0 : index
    %c0_89 = arith.constant 0 : index
    %183 = vector.load %arg6[%c0_88, %c0_89] : memref<8x256xf32, #tpu.memory_space<vmem>>, vector<8x256xf32>
    tpu.vector_store %arg6[%c0_88, %c0_89], %169 {strides = array<i32>} : memref<8x256xf32, #tpu.memory_space<vmem>>, vector<8x256xf32>,
    %c0_90 = arith.constant 0 : index
    %c0_91 = arith.constant 0 : index
    %184 = vector.load %arg7[%c0_90, %c0_91] : memref<8x256xf32, #tpu.memory_space<vmem>>, vector<8x256xf32>
    tpu.vector_store %arg7[%c0_90, %c0_91], %178 {strides = array<i32>} : memref<8x256xf32, #tpu.memory_space<vmem>>, vector<8x256xf32>,
    return
  }
  func.func @transform_0(%arg0: i32, %arg1: i32) -> (i32, i32, i32) {
    %c0_i32 = arith.constant 0 : i32
    %c0_i32_0 = arith.constant 0 : i32
    return %arg1, %c0_i32, %arg0 : i32, i32, i32
  }
  func.func @transform_1(%arg0: i32, %arg1: i32) -> (i32, i32) {
    %c0_i32 = arith.constant 0 : i32
    %c0_i32_0 = arith.constant 0 : i32
    %c0_i32_1 = arith.constant 0 : i32
    return %c0_i32, %c0_i32_0 : i32, i32
  }
  func.func @transform_2(%arg0: i32, %arg1: i32) -> (i32, i32) {
    %c0_i32 = arith.constant 0 : i32
    %c0_i32_0 = arith.constant 0 : i32
    %c0_i32_1 = arith.constant 0 : i32
    return %c0_i32, %c0_i32_0 : i32, i32
  }
  func.func @transform_3(%arg0: i32, %arg1: i32) -> (i32, i32, i32) {
    %c0_i32 = arith.constant 0 : i32
    %c0_i32_0 = arith.constant 0 : i32
    return %arg1, %c0_i32, %arg0 : i32, i32, i32
  }
  func.func @transform_4(%arg0: i32, %arg1: i32) -> (i32, i32) {
    %c0_i32 = arith.constant 0 : i32
    %c0_i32_0 = arith.constant 0 : i32
    return %c0_i32, %arg0 : i32, i32
  }
  func.func @transform_5(%arg0: i32, %arg1: i32) -> (i32, i32) {
    %c0_i32 = arith.constant 0 : i32
    %c0_i32_0 = arith.constant 0 : i32
    return %c0_i32, %arg0 : i32, i32
  }
}

</mosaic_0001>

<bundles_post_ra>
// kernel: tpu_custom_call.1
= control target key start
LH: loop header
LB: loop body
LE: loop exit
PB: predicated region body
PF: predicated region fallthrough
CT: control target
= control target key end

     0   :  { %s2424_s0 = inlined_call_operand.vmem [shape: bf16[8,36,512], index: 0, kind: input, shape index: {}]   ;;  %s2425_s1 = inlined_call_operand.vmem [shape: bf16[8,36], index: 1, kind: input, shape index: {}]   ;;  %s2426_s2 = inlined_call_operand.vmem [shape: f32[8,1], index: 2, kind: input, shape index: {}]   ;;  %s2427_s3 = inlined_call_operand.hbm [shape: bf16[8,8,512], index: 3, kind: output, shape index: {0}]   ;;  %s2428_s4 = inlined_call_operand.hbm [shape: f32[8,512], index: 4, kind: output, shape index: {1}]   ;;  %s2429_s5 = inlined_call_operand.hbm [shape: f32[8,512], index: 5, kind: output, shape index: {2}]  }
   0x1   :  { %2432 = sst [smem:[#allocation10_spill]] %s2424_s0 }
   0x2   :  { %11 = vsyncpa [#allocation4], 0 }
   0x3   :  { %13 = vsyncpa [#allocation4 + $0x1], 0 }
   0x4   :  { %14 = vsyncpa [#allocation6], 0 }
   0x5   :  { %16 = vsyncpa [#allocation6 + $0x1], 0  ;;  %s1992_s18 = smov 0   ;;  %s1994_s19 = smov 0  }
   0x6   :  { %s1996_s20 = smov 0   ;;  %s1998_s21 = smov 0  }
   0x7   :  { %s2000_s22 = smov 0   ;;  %s2002_s23 = smov 0  }
   0x8 LB: > { %s1514_s24 = sadd.s32 4294967295, %s1952_s23   ;;  %s2430_s25 = sadd.s32 4294967294, %s1952_s23   ;;  %s1952_s23 = sphi %s2002_s23, %s22_s23   ;;  %s1948_s22 = sphi %s2000_s22, %s2445_s22   ;;  %s1944_s21 = sphi %s1998_s21, %s2444_s21   ;;  %s1940_s20 = sphi %s1996_s20, %s2443_s20   ;;  %s1936_s19 = sphi %s1994_s19, %s2442_s19   ;;  %s1932_s18 = sphi %s1992_s18, %s2441_s18  }
   0x9   : > { %s34_s26 = sadd.s32 1, %s1948_s22  ;;  %s43_s27 = sadd.s32 1, %s1940_s20 }
   0xa   : > { %p36_p0 = scmp.ge.s32.totalorder %s34_s26, 2  ;;  %p50_p1 = scmp.ne.s32.totalorder %s1940_s20, %s1936_s19 }
   0xb   : > { %p51_p2 = scmp.eq.s32.totalorder %s1952_s23, 0  ;;  %p124_p3 = scmp.eq.s32.totalorder %s1514_s24, 1 }
   0xc   : > { %s2447_s26 = smov (%p36_p0, %s34_s26), 0  ;;  %p129_p6 = scmp.ne.s32.totalorder %s1936_s19, %s1932_s18 }
   0xd   : > { %p52_p4 = por %p51_p2, %p50_p1  ;;  %p2033_p5 = por %p124_p3, %p50_p1 }
   0xe   : > { %s39_s29 = ssub.s32 %s1948_s22, %s2447_s26  ;;  %p130_p8 = scmp.eq.s32.totalorder %s2430_s25, 1 }
   0xf   : > { %p41_p7 = scmp.eq.s32.totalorder %s39_s29, 0  ;;  %p1517_p10 = scmp.ge.s32.totalorder %s1952_s23, 2 }
  0x10   : > { %p2046_p9 = por %p130_p8, %p129_p6 }
  0x11   : > { %s2044_s30 = scalar_select %p41_p7, %s1940_s20, %s43_s27  }
  0x12   : > { %204 = sbr.rel (%p1517_p10) target bundleno = 55 (0x37), region = 24 }
  0x19   : > { %207 = sbr.rel (!%p52_p4) target bundleno = 55 (0x37), region = 28  ;;  %s209_s7 = sand.u32 (%p52_p4), 1, %s1940_s20  }
  0x1a   : > { %s1665_s8 = sshll.u32 (%p52_p4), %s1948_s22, 3  ;;  %s1677_s9 = smul.u32 (%p52_p4), 320, %s209_s7 }
  0x1b   : > { %s2435_s0 = sld [smem:[#allocation10_spill]] (%p52_p4) }
  0x1c   : > { %s2066_s13 = scalar_lea.vmem (%p52_p4), [#allocation2], %s1677_s9 }
  0x21   : > { %s2058_s12 = scalar_lea.vmem %s2435_s0, %s1665_s8 }
  0x22   : > { %v323_v0 = vld [vmem:[%s2058_s12] sm:$0xff]  ;;  %v325_v1 = vld [vmem:[%s2058_s12 + $0x10] sm:$0xff] }
  0x23   : > { %v327_v2 = vld [vmem:[%s2058_s12 + $0x20] sm:$0xff]  ;;  %v329_v3 = vld [vmem:[%s2058_s12 + $0x30] sm:$0xff]  ;;  %324 = vst [vmem:[%s2066_s13] sm:$0xff] %v323_v0  ;;  %326 = vst [vmem:[%s2066_s13 + $0x8] sm:$0xff] %v325_v1 }
  0x24   : > { %v331_v4 = vld [vmem:[%s2058_s12 + $0x40] sm:$0xff]  ;;  %v333_v5 = vld [vmem:[%s2058_s12 + $0x50] sm:$0xff]  ;;  %328 = vst [vmem:[%s2066_s13 + $0x10] sm:$0xff] %v327_v2  ;;  %330 = vst [vmem:[%s2066_s13 + $0x18] sm:$0xff] %v329_v3 }
  0x25   : > { %332 = vst [vmem:[%s2066_s13 + $0x20] sm:$0xff] %v331_v4  ;;  %334 = vst [vmem:[%s2066_s13 + $0x28] sm:$0xff] %v333_v5  ;;  %v335_v6 = vld [vmem:[%s2058_s12 + $0x60] sm:$0xff]  ;;  %v337_v7 = vld [vmem:[%s2058_s12 + $0x70] sm:$0xff] }
  0x26   : > { %v339_v8 = vld [vmem:[%s2058_s12 + $0x80] sm:$0xff]  ;;  %336 = vst [vmem:[%s2066_s13 + $0x30] sm:$0xff] %v335_v6  ;;  %338 = vst [vmem:[%s2066_s13 + $0x38] sm:$0xff] %v337_v7  ;;  %v341_v9 = vld [vmem:[%s2058_s12 + $0x90] sm:$0xff] }
  0x27   : > { %340 = vst [vmem:[%s2066_s13 + $0x40] sm:$0xff] %v339_v8  ;;  %v343_v10 = vld [vmem:[%s2058_s12 + $0xa0] sm:$0xff]  ;;  %v345_v11 = vld [vmem:[%s2058_s12 + $0xb0] sm:$0xff]  ;;  %342 = vst [vmem:[%s2066_s13 + $0x48] sm:$0xff] %v341_v9 }
  0x28   : > { %344 = vst [vmem:[%s2066_s13 + $0x50] sm:$0xff] %v343_v10  ;;  %346 = vst [vmem:[%s2066_s13 + $0x58] sm:$0xff] %v345_v11  ;;  %v347_v12 = vld [vmem:[%s2058_s12 + $0xc0] sm:$0xff]  ;;  %v349_v13 = vld [vmem:[%s2058_s12 + $0xd0] sm:$0xff] }
  0x29   : > { %v351_v14 = vld [vmem:[%s2058_s12 + $0xe0] sm:$0xff]  ;;  %348 = vst [vmem:[%s2066_s13 + $0x60] sm:$0xff] %v347_v12  ;;  %350 = vst [vmem:[%s2066_s13 + $0x68] sm:$0xff] %v349_v13  ;;  %v353_v15 = vld [vmem:[%s2058_s12 + $0xf0] sm:$0xff] }
  0x2a   : > { %352 = vst [vmem:[%s2066_s13 + $0x70] sm:$0xff] %v351_v14  ;;  %v355_v16 = vld [vmem:[%s2058_s12 + $0x100] sm:$0xff]  ;;  %v357_v17 = vld [vmem:[%s2058_s12 + $0x110] sm:$0xff]  ;;  %354 = vst [vmem:[%s2066_s13 + $0x78] sm:$0xff] %v353_v15 }
  0x2b   : > { %356 = vst [vmem:[%s2066_s13 + $0x80] sm:$0xff] %v355_v16  ;;  %358 = vst [vmem:[%s2066_s13 + $0x88] sm:$0xff] %v357_v17  ;;  %v359_v18 = vld [vmem:[%s2058_s12 + $0x120] sm:$0xff]  ;;  %v361_v19 = vld [vmem:[%s2058_s12 + $0x130] sm:$0xff] }
  0x2c   : > { %v363_v20 = vld [vmem:[%s2058_s12 + $0x140] sm:$0xff]  ;;  %360 = vst [vmem:[%s2066_s13 + $0x90] sm:$0xff] %v359_v18  ;;  %362 = vst [vmem:[%s2066_s13 + $0x98] sm:$0xff] %v361_v19  ;;  %v365_v21 = vld [vmem:[%s2058_s12 + $0x150] sm:$0xff] }
  0x2d   : > { %364 = vst [vmem:[%s2066_s13 + $0xa0] sm:$0xff] %v363_v20  ;;  %v367_v22 = vld [vmem:[%s2058_s12 + $0x160] sm:$0xff]  ;;  %v369_v23 = vld [vmem:[%s2058_s12 + $0x170] sm:$0xff]  ;;  %366 = vst [vmem:[%s2066_s13 + $0xa8] sm:$0xff] %v365_v21 }
  0x2e   : > { %368 = vst [vmem:[%s2066_s13 + $0xb0] sm:$0xff] %v367_v22  ;;  %370 = vst [vmem:[%s2066_s13 + $0xb8] sm:$0xff] %v369_v23  ;;  %v371_v24 = vld [vmem:[%s2058_s12 + $0x180] sm:$0xff]  ;;  %v373_v25 = vld [vmem:[%s2058_s12 + $0x190] sm:$0xff] }
  0x2f   : > { %v375_v26 = vld [vmem:[%s2058_s12 + $0x1a0] sm:$0xff]  ;;  %372 = vst [vmem:[%s2066_s13 + $0xc0] sm:$0xff] %v371_v24  ;;  %374 = vst [vmem:[%s2066_s13 + $0xc8] sm:$0xff] %v373_v25  ;;  %v377_v27 = vld [vmem:[%s2058_s12 + $0x1b0] sm:$0xff] }
  0x30   : > { %376 = vst [vmem:[%s2066_s13 + $0xd0] sm:$0xff] %v375_v26  ;;  %v379_v28 = vld [vmem:[%s2058_s12 + $0x1c0] sm:$0xff]  ;;  %v381_v29 = vld [vmem:[%s2058_s12 + $0x1d0] sm:$0xff]  ;;  %378 = vst [vmem:[%s2066_s13 + $0xd8] sm:$0xff] %v377_v27 }
  0x31   : > { %380 = vst [vmem:[%s2066_s13 + $0xe0] sm:$0xff] %v379_v28  ;;  %382 = vst [vmem:[%s2066_s13 + $0xe8] sm:$0xff] %v381_v29  ;;  %v383_v30 = vld [vmem:[%s2058_s12 + $0x1e0] sm:$0xff]  ;;  %v385_v31 = vld [vmem:[%s2058_s12 + $0x1f0] sm:$0xff] }
  0x32   : > { %v387_v32 = vld [vmem:[%s2058_s12 + $0x200] sm:$0xff]  ;;  %384 = vst [vmem:[%s2066_s13 + $0xf0] sm:$0xff] %v383_v30  ;;  %386 = vst [vmem:[%s2066_s13 + $0xf8] sm:$0xff] %v385_v31  ;;  %v389_v33 = vld [vmem:[%s2058_s12 + $0x210] sm:$0xff] }
  0x33   : > { %388 = vst [vmem:[%s2066_s13 + $0x100] sm:$0xff] %v387_v32  ;;  %v391_v34 = vld [vmem:[%s2058_s12 + $0x220] sm:$0xff]  ;;  %v393_v35 = vld [vmem:[%s2058_s12 + $0x230] sm:$0xff]  ;;  %390 = vst [vmem:[%s2066_s13 + $0x108] sm:$0xff] %v389_v33 }
  0x34   : > { %392 = vst [vmem:[%s2066_s13 + $0x110] sm:$0xff] %v391_v34  ;;  %394 = vst [vmem:[%s2066_s13 + $0x118] sm:$0xff] %v393_v35  ;;  %v395_v36 = vld [vmem:[%s2058_s12 + $0x240] sm:$0xff]  ;;  %v397_v37 = vld [vmem:[%s2058_s12 + $0x250] sm:$0xff] }
  0x35   : > { %v399_v38 = vld [vmem:[%s2058_s12 + $0x260] sm:$0xff]  ;;  %396 = vst [vmem:[%s2066_s13 + $0x120] sm:$0xff] %v395_v36  ;;  %398 = vst [vmem:[%s2066_s13 + $0x128] sm:$0xff] %v397_v37  ;;  %v401_v39 = vld [vmem:[%s2058_s12 + $0x270] sm:$0xff] }
  0x36   : > { %400 = vst [vmem:[%s2066_s13 + $0x130] sm:$0xff] %v399_v38  ;;  %402 = vst [vmem:[%s2066_s13 + $0x138] sm:$0xff] %v401_v39 }
  0x37 PF: > { %p1520_p11 = scmp.ge.s32.totalorder %s1952_s23, 1  ;;  %p407_p12 = scmp.lt.s32.totalorder %s1952_s23, 3 }
  0x39   : > { %p408_p13 = pnand %p1520_p11, %p407_p12 }
  0x3a   : > { %s2145_s14 = sand.u32 (!%p408_p13), 1, %s1936_s19   ;;  %v1954_v40 = vmov (!%p408_p13), 0   ;;  %v467_v41 = vld [vmem:[%s2426_s2] sm:$0xff] (!%p408_p13)  ;;  %vm511_vm0 = vcmask (!%p408_p13), 1041408   ;;  %vm507_vm1 = vcmask (!%p408_p13), 293888   ;;  %s2280_s11 = sand.u32 (!%p408_p13), 1, %s1514_s24  }
  0x3b   : > { %411 = sbr.rel (%p408_p13) target bundleno = 402 (0x192), region = 66  ;;  %550 = vmatprep.mubr.bf16.mxu0 (!%p408_p13), %v1954_v40  ;;  %653 = vmatprep.mubr.bf16.mxu1 (!%p408_p13), %v1954_v40  ;;  %v2175_v60 = vld [vmem:[%s2425_s1] sm:$0xf] (!%p408_p13)  ;;  %s1521_s8 = sshll.u32 (!%p408_p13), %s2145_s14, 6 }
  0x3c   : > { %s1678_s15 = smul.u32 (!%p408_p13), 320, %s2145_s14  ;;  %1749 = vset.pattern.permute.xlu0 (!%p408_p13), %v1954_v40  ;;  %s2248_s9 = scalar_lea.vmem (!%p408_p13), [#allocation3], %s1521_s8 }
  0x3d   : > { %479 = vperm.xlu0 (!%p408_p13), %1749, %v467_v41   ;;  %s1522_s10 = sshll.u32 (!%p408_p13), %s2145_s14, 4  ;;  %s2431_s12 = sshll.u32 (!%p408_p13), %s1944_s21, 8 }
  0x3e   : > { %s2154_s27 = scalar_lea.vmem (!%p408_p13), [#allocation2], %s1678_s15  ;;  %s443_s24 = scalar_lea.vmem (!%p408_p13), [#allocation5], %s1522_s10 }
  0x3f   : > { %v1750_v42 = vld [vmem:[%s2154_s27 + $0x4] ss:$8 sps:$4 sm:$0xff] (!%p408_p13)   ;;  %v1754_v44 = vld [vmem:[%s2154_s27] ss:$8 sps:$4 sm:$0xff] (!%p408_p13)   ;;  %v1756_v46 = vld [vmem:[%s2154_s27 + $0x14] ss:$8 sps:$4 sm:$0xff] (!%p408_p13)   ;;  %s2295_s29 = scalar_lea.hbm (!%p408_p13), %s2428_s4, %s2431_s12 }
  0x40   : > { %v1752_v43 = vld [vmem:[%s2154_s27 + $0x2c] ss:$8 sps:$4 sm:$0xff] (!%p408_p13)   ;;  %518 = vmatprep.subr.bf16.mxu0 (!%p408_p13), %v1750_v42  ;;  %v1755_v45 = vld [vmem:[%s2154_s27 + $0x28] ss:$8 sps:$4 sm:$0xff] (!%p408_p13)   ;;  %v1758_v47 = vld [vmem:[%s2154_s27 + $0x3c] ss:$8 sps:$4 sm:$0xff] (!%p408_p13)  }
  0x41   : > { %621 = vmatprep.subr.bf16.mxu1 (!%p408_p13), %v1752_v43  ;;  %519 = vmatpush1.bf16.msra.mxu0 (!%p408_p13), %v1754_v44  ;;  %v1760_v48 = vld [vmem:[%s2154_s27 + $0x10] ss:$8 sps:$4 sm:$0xff] (!%p408_p13)   ;;  %v476_v50 = vld [vmem:[%s2154_s27 + $0x20] sm:$0x33] (!%p408_p13)  ;;  %v1539_v51 = vld [vmem:[%s2154_s27 + $0x48] sm:$0x33] (!%p408_p13) }
  0x42   : > { %622 = vmatpush1.bf16.msra.mxu1 %v1755_v45  ;;  %520 = vmatprep.subr.bf16.mxu0 %v1756_v46  ;;  %v1761_v49 = vld [vmem:[%s2154_s27 + $0x38] ss:$8 sps:$4 sm:$0xff]   ;;  %v1529_v52 = vcombine.high %v476_v50, %v476_v50  ;;  %v1545_v53 = vcombine.high %v1539_v51, %v1539_v51  ;;  %v1528_v54 = vcombine.low %v476_v50, %v476_v50  ;;  %v1768_v56 = vld [vmem:[%s2154_s27 + $0x54] ss:$8 sps:$4 sm:$0xff]   ;;  %v1774_v63 = vld [vmem:[%s2154_s27 + $0x64] ss:$8 sps:$4 sm:$0xff]  }
  0x43   : > { %623 = vmatprep.subr.bf16.mxu1 %v1758_v47  ;;  %v1544_v55 = vcombine.low %v1539_v51, %v1539_v51  ;;  %v1771_v59 = vld [vmem:[%s2154_s27 + $0x7c] ss:$8 sps:$4 sm:$0xff]   ;;  %v1766_v61 = vld [vmem:[%s2154_s27 + $0x50] ss:$8 sps:$4 sm:$0xff]   ;;  %v1777_v0 = vld [vmem:[%s2154_s27 + $0x8c] ss:$8 sps:$4 sm:$0xff]  }
  0x44   : > { %v513_v57 = vsel %vm511_vm0, %v1528_v54, 0  ;;  %v1769_v62 = vld [vmem:[%s2154_s27 + $0x78] ss:$8 sps:$4 sm:$0xff]   ;;  %v1556_v1 = vld [vmem:[%s2154_s27 + $0x70] sm:$0x33]  ;;  %s1360_s13 = sshll.u32 %s443_s24, 4  ;;  %s2298_s13 = int_to_ptr.vmem [resolvable:$true] %s1360_s13 }
  0x45   : > { %521 = vmatpush1.bf16.msra.mxu0 %v1760_v48  ;;  %v616_v58 = vsel %vm511_vm0, %v1544_v55, 0  ;;  %v1573_v2 = vld [vmem:[%s2154_s27 + $0x98] sm:$0x33]  ;;  %v1772_v3 = vld [vmem:[%s2154_s27 + $0x60] ss:$8 sps:$4 sm:$0xff]   ;;  %v1562_v5 = vcombine.high %v1556_v1, %v1556_v1  ;;  %v1561_v7 = vcombine.low %v1556_v1, %v1556_v1  ;;  %s1674_s15 = sshll.u32 %s1944_s21, 7 }
  0x46   : > { %624 = vmatpush1.bf16.msra.mxu1 %v1761_v49  ;;  %1530 = vmatprep.subr.msk.bf16.mxu0 %vm511_vm0, %v1529_v52  ;;  %v1775_v4 = vld [vmem:[%s2154_s27 + $0x88] ss:$8 sps:$4 sm:$0xff]   ;;  %v1579_v6 = vcombine.high %v1573_v2, %v1573_v2  ;;  %v1578_v8 = vcombine.low %v1573_v2, %v1573_v2  ;;  %v1784_v9 = vld [vmem:[%s2154_s27 + $0xa4] ss:$8 sps:$4 sm:$0xff]   ;;  %v1790_v15 = vld [vmem:[%s2154_s27 + $0xb4] ss:$8 sps:$4 sm:$0xff]   ;;  %s2303_s25 = scalar_lea.hbm %s2427_s3, %s1674_s15 }
  0x47   : > { %1546 = vmatprep.subr.msk.bf16.mxu1 %vm511_vm0, %v1545_v53  ;;  %v720_v10 = vsel %vm511_vm0, %v1561_v7, 0  ;;  %v1787_v12 = vld [vmem:[%s2154_s27 + $0xcc] ss:$8 sps:$4 sm:$0xff]   ;;  %v1782_v13 = vld [vmem:[%s2154_s27 + $0xa0] ss:$8 sps:$4 sm:$0xff]   ;;  %s1343_s16 = sshll.u32 %s2248_s9, 4  ;;  %s2305_s16 = int_to_ptr.vmem [resolvable:$true] %s1343_s16 }
  0x48   : > { %v824_v11 = vsel %vm511_vm0, %v1578_v8, 0  ;;  %v1785_v14 = vld [vmem:[%s2154_s27 + $0xc8] ss:$8 sps:$4 sm:$0xff]   ;;  %v1793_v16 = vld [vmem:[%s2154_s27 + $0xdc] ss:$8 sps:$4 sm:$0xff]   ;;  %s2310_s17 = scalar_lea.vmem [#allocation7], %s1522_s10 }
  0x49   : > { %523 = vmatpush1.bf16.msra.mxu0 %v513_v57  ;;  %v1590_v17 = vld [vmem:[%s2154_s27 + $0xc0] sm:$0x33]  ;;  %v1607_v18 = vld [vmem:[%s2154_s27 + $0xe8] sm:$0x33]  ;;  %v1788_v19 = vld [vmem:[%s2154_s27 + $0xb0] ss:$8 sps:$4 sm:$0xff]  }
  0x4a   : > { %626 = vmatpush1.bf16.msra.mxu1 %v616_v58  ;;  %725 = vmatprep.subr.bf16.mxu0 %v1768_v56  ;;  %v1791_v20 = vld [vmem:[%s2154_s27 + $0xd8] ss:$8 sps:$4 sm:$0xff]   ;;  %v1596_v21 = vcombine.high %v1590_v17, %v1590_v17  ;;  %v1613_v22 = vcombine.high %v1607_v18, %v1607_v18  ;;  %v1595_v23 = vcombine.low %v1590_v17, %v1590_v17  ;;  %v1800_v27 = vld [vmem:[%s2154_s27 + $0xf4] ss:$8 sps:$4 sm:$0xff]   ;;  %v1806_v31 = vld [vmem:[%s2154_s27 + $0x104] ss:$8 sps:$4 sm:$0xff]  }
  0x4b   : > { %829 = vmatprep.subr.bf16.mxu1 %v1771_v59  ;;  %v1612_v24 = vcombine.low %v1607_v18, %v1607_v18  ;;  %v1803_v28 = vld [vmem:[%s2154_s27 + $0x11c] ss:$8 sps:$4 sm:$0xff]   ;;  %v1798_v29 = vld [vmem:[%s2154_s27 + $0xf0] ss:$8 sps:$4 sm:$0xff]   ;;  %v1809_v32 = vld [vmem:[%s2154_s27 + $0x12c] ss:$8 sps:$4 sm:$0xff]  }
  0x4c   : > { %1531 = vmatmul.mubr.msk.bf16.vlgmr.msra.gmra.mrb[0].mxu0 %vm507_vm1, %v2175_v60  ;;  %v928_v25 = vsel %vm511_vm0, %v1595_v23, 0  ;;  %v1801_v30 = vld [vmem:[%s2154_s27 + $0x118] ss:$8 sps:$4 sm:$0xff]   ;;  %v1624_v33 = vld [vmem:[%s2154_s27 + $0x110] sm:$0x33]  ;;  %v1955_v56 = vmov 0.0  }
  0x4d   : > { %1547 = vmatmul.mubr.msk.bf16.vlgmr.msra.gmra.mrb[0].mxu1 %vm507_vm1, %v2175_v60  ;;  %726 = vmatpush1.bf16.msra.mxu0 %v1766_v61  ;;  %v1032_v26 = vsel %vm511_vm0, %v1612_v24, 0  ;;  %v1641_v34 = vld [vmem:[%s2154_s27 + $0x138] sm:$0x33]  ;;  %v1804_v35 = vld [vmem:[%s2154_s27 + $0x100] ss:$8 sps:$4 sm:$0xff]   ;;  %v1630_v37 = vcombine.high %v1624_v33, %v1624_v33  ;;  %v1629_v39 = vcombine.low %v1624_v33, %v1624_v33  ;;  %s1814_s7 = scalar_lea.vmem %s2298_s13, 256 }
  0x4e   : > { %830 = vmatpush1.bf16.msra.mxu1 %v1769_v62  ;;  %727 = vmatprep.subr.bf16.mxu0 %v1774_v63  ;;  %v1807_v36 = vld [vmem:[%s2154_s27 + $0x128] ss:$8 sps:$4 sm:$0xff]   ;;  %v1647_v38 = vcombine.high %v1641_v34, %v1641_v34  ;;  %v1646_v41 = vcombine.low %v1641_v34, %v1641_v34  ;;  %p1815_p0 = scmp.ne.s32.totalorder %s2298_s13, %s1814_s7  ;;  %s1956_s15 = smov [#allocation5]  }
  0x4f   : > { %831 = vmatprep.subr.bf16.mxu1 %v1777_v0  ;;  %757 = vmatprep.mubr.bf16.mxu0 %v1954_v40  ;;  %v1136_v42 = vsel %vm511_vm0, %v1629_v39, 0  ;;  %s1818_s8 = sshll.u32 %s1956_s15, 4  ;;  %s1819_s8 = int_to_ptr.vmem [resolvable:$false] %s1818_s8 }
  0x50   : > { %861 = vmatprep.mubr.bf16.mxu1 %v1954_v40  ;;  %v1240_v43 = vsel %vm511_vm0, %v1646_v41, 0  ;;  %p1816_p1 = pnand %p1815_p0, %p2033_p5  ;;  %s1820_s0 = scalar_lea.vmem %s1819_s8, 512 }
  0x51   : > { %728 = vmatpush1.bf16.msra.mxu0 %v1772_v3  ;;  %p1821_p3 = scmp.lt.s32.totalorder %s2298_s13, %s1819_s8  ;;  %p1822_p4 = scmp.lt.s32.totalorder %s1820_s0, %s1814_s7 }
  0x52   : > { %832 = vmatpush1.bf16.msra.mxu1 %v1775_v4  ;;  %1563 = vmatprep.subr.msk.bf16.mxu0 %vm511_vm0, %v1562_v5  ;;  %p1817_p2 = pneg %p1816_p1 }
  0x53   : > { %1580 = vmatprep.subr.msk.bf16.mxu1 %vm511_vm0, %v1579_v6  ;;  %p1823_p6 = por %p1822_p4, %p1821_p3 }
  0x55   : > { %730 = vmatpush1.bf16.msra.mxu0 %v720_v10  ;;  %p1824_p7 = pnand %p1823_p6, %p1817_p2 }
  0x56   : > { %834 = vmatpush1.bf16.msra.mxu1 %v824_v11  ;;  %933 = vmatprep.subr.bf16.mxu0 %v1784_v9 }
  0x57   : > { %1037 = vmatprep.subr.bf16.mxu1 %v1787_v12 }
  0x58   : > { %1564 = vmatmul.mubr.msk.bf16.vlgmr.msra.gmra.mrb[4].mxu0 %vm507_vm1, %v2175_v60 }
  0x59   : > { %1581 = vmatmul.mubr.msk.bf16.vlgmr.msra.gmra.mrb[4].mxu1 %vm507_vm1, %v2175_v60  ;;  %934 = vmatpush1.bf16.msra.mxu0 %v1782_v13 }
  0x5a   : > { %1038 = vmatpush1.bf16.msra.mxu1 %v1785_v14  ;;  %935 = vmatprep.subr.bf16.mxu0 %v1790_v15 }
  0x5b   : > { %1039 = vmatprep.subr.bf16.mxu1 %v1793_v16  ;;  %965 = vmatprep.mubr.bf16.mxu0 %v1954_v40 }
  0x5c   : > { %1069 = vmatprep.mubr.bf16.mxu1 %v1954_v40 }
  0x5d   : > { %936 = vmatpush1.bf16.msra.mxu0 %v1788_v19 }
  0x5e   : > { %1040 = vmatpush1.bf16.msra.mxu1 %v1791_v20  ;;  %1597 = vmatprep.subr.msk.bf16.mxu0 %vm511_vm0, %v1596_v21 }
  0x5f   : > { %1614 = vmatprep.subr.msk.bf16.mxu1 %vm511_vm0, %v1613_v22 }
  0x61   : > { %938 = vmatpush1.bf16.msra.mxu0 %v928_v25 }
  0x62   : > { %1042 = vmatpush1.bf16.msra.mxu1 %v1032_v26  ;;  %1141 = vmatprep.subr.bf16.mxu0 %v1800_v27 }
  0x63   : > { %1245 = vmatprep.subr.bf16.mxu1 %v1803_v28 }
  0x64   : > { %1598 = vmatmul.mubr.msk.bf16.vlgmr.msra.gmra.mrb[8].mxu0 %vm507_vm1, %v2175_v60 }
  0x65   : > { %1615 = vmatmul.mubr.msk.bf16.vlgmr.msra.gmra.mrb[8].mxu1 %vm507_vm1, %v2175_v60  ;;  %1142 = vmatpush1.bf16.msra.mxu0 %v1798_v29 }
  0x66   : > { %1246 = vmatpush1.bf16.msra.mxu1 %v1801_v30  ;;  %1143 = vmatprep.subr.bf16.mxu0 %v1806_v31 }
  0x67   : > { %1247 = vmatprep.subr.bf16.mxu1 %v1809_v32  ;;  %1173 = vmatprep.mubr.bf16.mxu0 %v1954_v40 }
  0x68   : > { %1277 = vmatprep.mubr.bf16.mxu1 %v1954_v40 }
  0x69   : > { %1144 = vmatpush1.bf16.msra.mxu0 %v1804_v35 }
  0x6a   : > { %1248 = vmatpush1.bf16.msra.mxu1 %v1807_v36  ;;  %1631 = vmatprep.subr.msk.bf16.mxu0 %vm511_vm0, %v1630_v37 }
  0x6b   : > { %1648 = vmatprep.subr.msk.bf16.mxu1 %vm511_vm0, %v1647_v38 }
  0x6d   : > { %1146 = vmatpush1.bf16.msra.mxu0 %v1136_v42 }
  0x6e   : > { %1250 = vmatpush1.bf16.msra.mxu1 %v1240_v43 }
  0x70   : > { %1632 = vmatmul.mubr.msk.bf16.vlgmr.msra.gmra.mrb[12].mxu0 %vm507_vm1, %v2175_v60 }
  0x71   : > { %1649 = vmatmul.mubr.msk.bf16.vlgmr.msra.gmra.mrb[12].mxu1 %vm507_vm1, %v2175_v60 }
  0xbc   : > { %v2239_v40 = vpop.permute.xlu0 %479 }
 0x11f   : > { %v552_v44 = vpop.f32.mrb[0].mxu0 }
 0x120   : > { %v655_v45 = vpop.f32.mrb[0].mxu1  ;;  %v553_v46 = vadd.f32 %v552_v44, %v2239_v40  ;;  %v554_v47 = vpop.f32.mrb[1].mxu0 }
 0x121   : > { %v657_v48 = vpop.f32.mrb[1].mxu1  ;;  %v555_v49 = vadd.f32 %v554_v47, %v2239_v40  ;;  %v556_v50 = vpop.f32.mrb[2].mxu0  ;;  %v656_v54 = vadd.f32 %v655_v45, %v2239_v40 }
 0x122   : > { %v659_v51 = vpop.f32.mrb[2].mxu1  ;;  %v557_v52 = vpop.f32.mrb[3].mxu0  ;;  %vm565_vm2 = vcmp.gt.f32.partialorder %v553_v46, 1.0  ;;  %v662_v55 = vmul.f32 0.7788008, %v553_v46  ;;  %v658_v58 = vadd.f32 %v657_v48, %v2239_v40 }
 0x123   : > { %v660_v53 = vpop.f32.mrb[3].mxu1  ;;  %v1532_v57 = vsel %vm565_vm2, 1.0, %v1955_v56  ;;  %vm566_vm3 = vcmp.gt.f32.partialorder %v555_v49, 1.0  ;;  %v663_v59 = vmul.f32 0.7788008, %v555_v49 }
 0x124   : > { %v664_v60 = vadd.f32 %v662_v55, %v656_v54  ;;  %v1533_v61 = vsel %vm566_vm3, 1.0, %v1955_v56  ;;  %v674_v2 = vmul.f32 0.7788008, %v1532_v57 }
 0x125   : > { %v1666_v62 = vpack.c.bf16 %v1533_v61, %v1532_v57  ;;  %v665_v63 = vadd.f32 %v663_v59, %v658_v58  ;;  %v675_v5 = vmul.f32 0.7788008, %v1533_v61 }
 0x126   : > { %v666_v0 = vsub.f32 %v664_v60, %v1532_v57 }
 0x127   : > { %583 = vst [vmem:[%s2248_s9] sm:$0xff] %v1666_v62  ;;  %v667_v1 = vsub.f32 %v665_v63, %v1533_v61 }
 0x128   : > { %vm668_vm4 = vcmp.gt.f32.partialorder %v666_v0, 1.0  ;;  %v766_v7 = vmul.f32 0.7788008, %v666_v0 }
 0x129   : > { %vm669_vm5 = vcmp.gt.f32.partialorder %v667_v1, 1.0  ;;  %v1548_v10 = vsel %vm668_vm4, 1.0, %v1955_v56  ;;  %v767_v12 = vmul.f32 0.7788008, %v667_v1 }
 0x12a   : > { %v676_v15 = vadd.f32 %v1548_v10, %v674_v2  ;;  %v1549_v17 = vsel %vm669_vm5, 1.0, %v1955_v56 }
 0x12b   : > { %v759_v3 = vpop.f32.mrb[4].mxu0  ;;  %v677_v20 = vadd.f32 %v1549_v17, %v675_v5  ;;  %v1667_v21 = vpack.c.bf16 %v1549_v17, %v1548_v10 }
 0x12c   : > { %v863_v4 = vpop.f32.mrb[4].mxu1  ;;  %v760_v6 = vadd.f32 %v759_v3, %v2239_v40  ;;  %v761_v8 = vpop.f32.mrb[5].mxu0  ;;  %v778_v26 = vmul.f32 0.7788008, %v676_v15 }
 0x12d   : > { %v865_v9 = vpop.f32.mrb[5].mxu1  ;;  %v762_v11 = vadd.f32 %v761_v8, %v2239_v40  ;;  %v763_v13 = vpop.f32.mrb[6].mxu0  ;;  %v864_v24 = vadd.f32 %v863_v4, %v2239_v40  ;;  %1551 = vst [vmem:[%s2248_s9 + $0x8] sm:$0xff] %v1667_v21  ;;  %v779_v30 = vmul.f32 0.7788008, %v677_v20 }
 0x12e   : > { %v867_v14 = vpop.f32.mrb[6].mxu1  ;;  %v768_v16 = vadd.f32 %v766_v7, %v760_v6  ;;  %v764_v18 = vpop.f32.mrb[7].mxu0  ;;  %v866_v28 = vadd.f32 %v865_v9, %v2239_v40 }
 0x12f   : > { %v868_v19 = vpop.f32.mrb[7].mxu1  ;;  %v769_v22 = vadd.f32 %v767_v12, %v762_v11 }
 0x130   : > { %v770_v23 = vsub.f32 %v768_v16, %v676_v15 }
 0x131   : > { %v771_v25 = vsub.f32 %v769_v22, %v677_v20 }
 0x132   : > { %vm772_vm6 = vcmp.gt.f32.partialorder %v770_v23, 1.0  ;;  %v870_v27 = vmul.f32 0.7788008, %v770_v23 }
 0x133   : > { %v1565_v29 = vsel %vm772_vm6, 1.0, %v1955_v56  ;;  %vm773_vm7 = vcmp.gt.f32.partialorder %v771_v25, 1.0  ;;  %v871_v31 = vmul.f32 0.7788008, %v771_v25 }
 0x134   : > { %v780_v32 = vadd.f32 %v1565_v29, %v778_v26  ;;  %v872_v33 = vadd.f32 %v870_v27, %v864_v24  ;;  %v1566_v34 = vsel %vm773_vm7, 1.0, %v1955_v56 }
 0x135   : > { %v781_v35 = vadd.f32 %v1566_v34, %v779_v30  ;;  %v1668_v36 = vpack.c.bf16 %v1566_v34, %v1565_v29  ;;  %v873_v37 = vadd.f32 %v871_v31, %v866_v28 }
 0x136   : > { %v874_v38 = vsub.f32 %v872_v33, %v780_v32  ;;  %v882_v41 = vmul.f32 0.7788008, %v780_v32 }
 0x137   : > { %1568 = vst [vmem:[%s2248_s9 + $0x10] sm:$0xff] %v1668_v36  ;;  %v875_v39 = vsub.f32 %v873_v37, %v781_v35  ;;  %v967_v42 = vpop.f32.mrb[8].mxu0  ;;  %v883_v44 = vmul.f32 0.7788008, %v781_v35 }
 0x138   : > { %v1071_v43 = vpop.f32.mrb[8].mxu1  ;;  %vm876_vm8 = vcmp.gt.f32.partialorder %v874_v38, 1.0  ;;  %v968_v45 = vadd.f32 %v967_v42, %v2239_v40  ;;  %v974_v46 = vmul.f32 0.7788008, %v874_v38  ;;  %v969_v47 = vpop.f32.mrb[9].mxu0 }
 0x139   : > { %v1073_v48 = vpop.f32.mrb[9].mxu1  ;;  %vm877_vm9 = vcmp.gt.f32.partialorder %v875_v39, 1.0  ;;  %v1582_v49 = vsel %vm876_vm8, 1.0, %v1955_v56  ;;  %v970_v50 = vadd.f32 %v969_v47, %v2239_v40  ;;  %v975_v51 = vmul.f32 0.7788008, %v875_v39  ;;  %v971_v52 = vpop.f32.mrb[10].mxu0 }
 0x13a   : > { %v1075_v53 = vpop.f32.mrb[10].mxu1  ;;  %v884_v54 = vadd.f32 %v1582_v49, %v882_v41  ;;  %v976_v55 = vadd.f32 %v974_v46, %v968_v45  ;;  %v1583_v57 = vsel %vm877_vm9, 1.0, %v1955_v56  ;;  %v972_v58 = vpop.f32.mrb[11].mxu0  ;;  %v1072_v0 = vadd.f32 %v1071_v43, %v2239_v40 }
 0x13b   : > { %v1076_v59 = vpop.f32.mrb[11].mxu1  ;;  %v885_v60 = vadd.f32 %v1583_v57, %v883_v44  ;;  %v1669_v61 = vpack.c.bf16 %v1583_v57, %v1582_v49  ;;  %v977_v62 = vadd.f32 %v975_v51, %v970_v50  ;;  %v1074_v4 = vadd.f32 %v1073_v48, %v2239_v40 }
 0x13c   : > { %v978_v63 = vsub.f32 %v976_v55, %v884_v54  ;;  %v986_v2 = vmul.f32 0.7788008, %v884_v54 }
 0x13d   : > { %1585 = vst [vmem:[%s2248_s9 + $0x18] sm:$0xff] %v1669_v61  ;;  %v979_v1 = vsub.f32 %v977_v62, %v885_v60  ;;  %v987_v6 = vmul.f32 0.7788008, %v885_v60 }
 0x13e   : > { %vm980_vm10 = vcmp.gt.f32.partialorder %v978_v63, 1.0  ;;  %v1078_v3 = vmul.f32 0.7788008, %v978_v63 }
 0x13f   : > { %v1599_v5 = vsel %vm980_vm10, 1.0, %v1955_v56  ;;  %vm981_vm11 = vcmp.gt.f32.partialorder %v979_v1, 1.0  ;;  %v1079_v7 = vmul.f32 0.7788008, %v979_v1 }
 0x140   : > { %v988_v8 = vadd.f32 %v1599_v5, %v986_v2  ;;  %v1080_v9 = vadd.f32 %v1078_v3, %v1072_v0  ;;  %v1600_v10 = vsel %vm981_vm11, 1.0, %v1955_v56 }
 0x141   : > { %v989_v11 = vadd.f32 %v1600_v10, %v987_v6  ;;  %v1670_v12 = vpack.c.bf16 %v1600_v10, %v1599_v5  ;;  %v1081_v13 = vadd.f32 %v1079_v7, %v1074_v4 }
 0x142   : > { %v1082_v14 = vsub.f32 %v1080_v9, %v988_v8  ;;  %v1090_v16 = vmul.f32 0.7788008, %v988_v8 }
 0x143   : > { %1602 = vst [vmem:[%s2248_s9 + $0x20] sm:$0xff] %v1670_v12  ;;  %v1083_v15 = vsub.f32 %v1081_v13, %v989_v11  ;;  %v1175_v17 = vpop.f32.mrb[12].mxu0  ;;  %v1091_v19 = vmul.f32 0.7788008, %v989_v11 }
 0x144   : > { %v1279_v18 = vpop.f32.mrb[12].mxu1  ;;  %vm1084_vm12 = vcmp.gt.f32.partialorder %v1082_v14, 1.0  ;;  %v1176_v20 = vadd.f32 %v1175_v17, %v2239_v40  ;;  %v1182_v21 = vmul.f32 0.7788008, %v1082_v14  ;;  %v1177_v22 = vpop.f32.mrb[13].mxu0 }
 0x145   : > { %v1281_v23 = vpop.f32.mrb[13].mxu1  ;;  %vm1085_vm13 = vcmp.gt.f32.partialorder %v1083_v15, 1.0  ;;  %v1616_v24 = vsel %vm1084_vm12, 1.0, %v1955_v56  ;;  %v1178_v25 = vadd.f32 %v1177_v22, %v2239_v40  ;;  %v1183_v26 = vmul.f32 0.7788008, %v1083_v15  ;;  %v1179_v27 = vpop.f32.mrb[14].mxu0 }
 0x146   : > { %v1283_v28 = vpop.f32.mrb[14].mxu1  ;;  %v1092_v29 = vadd.f32 %v1616_v24, %v1090_v16  ;;  %v1184_v30 = vadd.f32 %v1182_v21, %v1176_v20  ;;  %v1617_v31 = vsel %vm1085_vm13, 1.0, %v1955_v56  ;;  %v1180_v32 = vpop.f32.mrb[15].mxu0  ;;  %v1280_v38 = vadd.f32 %v1279_v18, %v2239_v40 }
 0x147   : > { %v1284_v33 = vpop.f32.mrb[15].mxu1  ;;  %v1093_v34 = vadd.f32 %v1617_v31, %v1091_v19  ;;  %v1671_v35 = vpack.c.bf16 %v1617_v31, %v1616_v24  ;;  %v1185_v36 = vadd.f32 %v1183_v26, %v1178_v25  ;;  %v1282_v43 = vadd.f32 %v1281_v23, %v2239_v40 }
 0x148   : > { %v1186_v37 = vsub.f32 %v1184_v30, %v1092_v29  ;;  %v1194_v41 = vmul.f32 0.7788008, %v1092_v29 }
 0x149   : > { %1619 = vst [vmem:[%s2248_s9 + $0x28] sm:$0xff] %v1671_v35  ;;  %v1187_v39 = vsub.f32 %v1185_v36, %v1093_v34  ;;  %v1195_v45 = vmul.f32 0.7788008, %v1093_v34 }
 0x14a   : > { %vm1188_vm14 = vcmp.gt.f32.partialorder %v1186_v37, 1.0  ;;  %v1286_v42 = vmul.f32 0.7788008, %v1186_v37 }
 0x14b   : > { %v1633_v44 = vsel %vm1188_vm14, 1.0, %v1955_v56  ;;  %vm1189_vm15 = vcmp.gt.f32.partialorder %v1187_v39, 1.0  ;;  %v1287_v46 = vmul.f32 0.7788008, %v1187_v39 }
 0x14c   : > { %v1196_v47 = vadd.f32 %v1633_v44, %v1194_v41  ;;  %v1288_v48 = vadd.f32 %v1286_v42, %v1280_v38  ;;  %v1634_v49 = vsel %vm1189_vm15, 1.0, %v1955_v56 }
 0x14d   : > { %v1197_v50 = vadd.f32 %v1634_v49, %v1195_v45  ;;  %v1672_v51 = vpack.c.bf16 %v1634_v49, %v1633_v44  ;;  %v1289_v52 = vadd.f32 %v1287_v46, %v1282_v43 }
 0x14e   : > { %v1290_v40 = vsub.f32 %v1288_v48, %v1196_v47  ;;  %v1298_v54 = vmul.f32 0.7788008, %v1196_v47 }
 0x14f   : > { %1636 = vst [vmem:[%s2248_s9 + $0x30] sm:$0xff] %v1672_v51  ;;  %v1291_v53 = vsub.f32 %v1289_v52, %v1197_v50  ;;  %v1299_v57 = vmul.f32 0.7788008, %v1197_v50 }
 0x150   : > { %vm1292_vm0 = vcmp.gt.f32.partialorder %v1290_v40, 1.0  ;;  %1312 = vst [vmem:[%s443_s24] sm:$0xff] %v1290_v40 }
 0x151   : > { %v1650_v55 = vsel %vm1292_vm0, 1.0, %v1955_v56  ;;  %vm1293_vm1 = vcmp.gt.f32.partialorder %v1291_v53, 1.0  ;;  %1313 = vst [vmem:[%s443_s24 + $0x8] sm:$0xff] %v1291_v53 }
 0x152   : > { %v1300_v58 = vadd.f32 %v1650_v55, %v1298_v54  ;;  %v1651_v59 = vsel %vm1293_vm1, 1.0, %v1955_v56 }
 0x153   : > { %1827 = shalt.err (!%p1824_p7)
}
 0x154   : > { %s1828_s10 = scalar_lea.hbm %s2295_s29, 256  ;;  %s1832_s15 = scalar_lea.hbm %s2428_s4, 512 }
 0x155   : > { %p1829_p8 = scmp.ne.s32.totalorder %s2295_s29, %s1828_s10  ;;  %p1833_p13 = scmp.lt.u32.totalorder %s2295_s29, %s2428_s4 }
 0x156   : > { %p1834_p0 = scmp.lt.u32.totalorder %s1832_s15, %s1828_s10  ;;  %p1836_p2 = scmp.lt.u32.totalorder %s1828_s10, %s2295_s29 }
 0x157   : > { %p1830_p11 = pnand %p1829_p8, %p2033_p5 }
 0x158   : > { %p1835_p1 = por %p1834_p0, %p1833_p13 }
 0x159   : > { %p1831_p12 = pneg %p1830_p11 }
 0x15a   : > { %p1837_p3 = por %p1836_p2, %p1835_p1 }
 0x15c   : > { %p1838_p4 = pnand %p1837_p3, %p1831_p12 }
 0x15e   : > { %1841 = shalt.err (!%p1838_p4)
}
 0x15f   : > { %s2436_s0 = scalar_lea.sflag [#allocation6], %s2280_s11  ;;  %v1301_v56 = vadd.f32 %v1651_v59, %v1299_v57  ;;  %v1673_v60 = vpack.c.bf16 %v1651_v59, %v1650_v55  ;;  %1314 = vst [vmem:[%s2310_s17] sm:$0xff] %v1300_v58  ;;  %s2437_s12 = sshll.u32 %s1944_s21, 8 }
 0x160   : > { %1680 = dma.vmem_to_hbm [thread:$0]  (%p2033_p5), %s2298_s13, 256, %s2295_s29, %s2436_s0  }
 0x161   : > { %s2344_s10 = scalar_lea.hbm %s2429_s5, %s2437_s12  ;;  %s2438_s24 = sshll.u32 %s2310_s17, 4  ;;  %1653 = vst [vmem:[%s2248_s9 + $0x38] sm:$0xff] %v1673_v60  ;;  %1315 = vst [vmem:[%s2310_s17 + $0x8] sm:$0xff] %v1301_v56  ;;  %s2348_s24 = int_to_ptr.vmem [resolvable:$true] %s2438_s24 }
 0x162   : > { %s1317_s15 = scalar_lea.sflag [#allocation4], %s2145_s14  ;;  %s1842_s8 = scalar_lea.vmem %s2305_s16, 1024 }
 0x163   : > { %p1843_p6 = scmp.ne.s32.totalorder %s2305_s16, %s1842_s8  ;;  %s1957_s13 = smov [#allocation3]  }
 0x164   : > { %s1846_s29 = sshll.u32 %s1957_s13, 4  ;;  %s1847_s29 = int_to_ptr.vmem [resolvable:$false] %s1846_s29 }
 0x165   : > { %p1844_p7 = pnand %p1843_p6, %p2033_p5  ;;  %s1848_s21 = scalar_lea.vmem %s1847_s29, 2048 }
 0x166   : > { %p1849_p11 = scmp.lt.s32.totalorder %s2305_s16, %s1847_s29  ;;  %p1850_p12 = scmp.lt.s32.totalorder %s1848_s21, %s1842_s8 }
 0x167   : > { %p1845_p8 = pneg %p1844_p7 }
 0x168   : > { %p1851_p13 = por %p1850_p12, %p1849_p11 }
 0x16a   : > { %p1852_p0 = pnand %p1851_p13, %p1845_p8 }
 0x16c   : > { %1855 = shalt.err (!%p1852_p0)
}
 0x16d   : > { %s1856_s9 = scalar_lea.hbm %s2303_s25, 1024  ;;  %s1860_s12 = scalar_lea.hbm %s2427_s3, 2048 }
 0x16e   : > { %p1857_p1 = scmp.ne.s32.totalorder %s2303_s25, %s1856_s9  ;;  %p1861_p4 = scmp.lt.u32.totalorder %s2303_s25, %s2427_s3 }
 0x16f   : > { %p1862_p6 = scmp.lt.u32.totalorder %s1860_s12, %s1856_s9  ;;  %p1864_p8 = scmp.lt.u32.totalorder %s1856_s9, %s2303_s25 }
 0x170   : > { %p1858_p2 = pnand %p1857_p1, %p2033_p5 }
 0x171   : > { %p1863_p7 = por %p1862_p6, %p1861_p4 }
 0x172   : > { %p1859_p3 = pneg %p1858_p2 }
 0x173   : > { %p1865_p11 = por %p1864_p8, %p1863_p7 }
 0x175   : > { %p1866_p12 = pnand %p1865_p11, %p1859_p3 }
 0x177   : > { %1869 = shalt.err (!%p1866_p12)
}
 0x178   : > { %s1958_s8 = smov 128   ;;  %s1959_s13 = smov 256  }
 0x179   : > { %s1960_s29 = smov 8   ;;  %s1870_s21 = scalar_lea.vmem %s2348_s24, 256 }
 0x17a   : > { %1679 = dma.vmem_to_hbm [thread:$0]  (%p2033_p5), %s2305_s16, 1024, %s2303_s25, %s1317_s15, %s1958_s8, %s1959_s13, %s1960_s29  }
 0x17b   : > { %p1871_p13 = scmp.ne.s32.totalorder %s2348_s24, %s1870_s21  ;;  %s1961_s9 = smov [#allocation7]  }
 0x17c   : > { %s1874_s17 = sshll.u32 %s1961_s9, 4  ;;  %s1875_s17 = int_to_ptr.vmem [resolvable:$false] %s1874_s17 }
 0x17d   : > { %p1872_p0 = pnand %p1871_p13, %p2033_p5  ;;  %s1876_s0 = scalar_lea.vmem %s1875_s17, 512 }
 0x17e   : > { %p1877_p2 = scmp.lt.s32.totalorder %s2348_s24, %s1875_s17  ;;  %p1878_p3 = scmp.lt.s32.totalorder %s1876_s0, %s1870_s21 }
 0x17f   : > { %p1873_p1 = pneg %p1872_p0 }
 0x180   : > { %p1879_p4 = por %p1878_p3, %p1877_p2 }
 0x182   : > { %p1880_p6 = pnand %p1879_p4, %p1873_p1 }
 0x184   : > { %1883 = shalt.err (!%p1880_p6)
}
 0x185   : > { %s1884_s25 = scalar_lea.hbm %s2344_s10, 256  ;;  %s1888_s15 = scalar_lea.hbm %s2429_s5, 512 }
 0x186   : > { %p1885_p7 = scmp.ne.s32.totalorder %s2344_s10, %s1884_s25  ;;  %p1889_p12 = scmp.lt.u32.totalorder %s2344_s10, %s2429_s5 }
 0x187   : > { %p1890_p13 = scmp.lt.u32.totalorder %s1888_s15, %s1884_s25  ;;  %p1892_p1 = scmp.lt.u32.totalorder %s1884_s25, %s2344_s10 }
 0x188   : > { %p1886_p8 = pnand %p1885_p7, %p2033_p5 }
 0x189   : > { %p1891_p0 = por %p1890_p13, %p1889_p12 }
 0x18a   : > { %p1887_p11 = pneg %p1886_p8 }
 0x18b   : > { %p1893_p2 = por %p1892_p1, %p1891_p0 }
 0x18d   : > { %p1894_p3 = pnand %p1893_p2, %p1887_p11 }
 0x18f   : > { %1897 = shalt.err (!%p1894_p3)
}
 0x190   : > { %s2439_s7 = scalar_lea.sflag [#allocation6], %s2280_s11 }
 0x191   : > { %1681 = dma.vmem_to_hbm [thread:$0]  (%p2033_p5), %s2348_s24, 256, %s2344_s10, %s2439_s7  }
 0x192 PF: > { %s1386_s8 = sand.u32 1, %s1932_s18   ;;  %p1686_p4 = pnand %p1517_p10, %p2046_p9 }
 0x193   : > { %s1387_s13 = scalar_lea.sflag [#allocation4], %s1386_s8 }
 0x194   : > { %1923 = dma.done.wait (!%p1686_p4), %s1387_s13, 1024  }
 0x195   : > { %1925 = vsyncadd (!%p1686_p4), %s1387_s13, 4294966272  ;;  %s2440_s29 = sadd.s32 4294967294, %s1952_s23  }
 0x196   : > { %s1395_s21 = sand.u32 1, %s2440_s29  }
 0x197   : > { %s1396_s28 = scalar_lea.sflag [#allocation6], %s1395_s21 }
 0x198   : > { %1927 = dma.done.wait (!%p1686_p4), %s1396_s28, 512  }
 0x199   : > { %1929 = vsyncadd (!%p1686_p4), %s1396_s28, 4294966784  ;;  %s22_s23 = sadd.s32 1, %s1952_s23   ;;  %s2441_s18 = smov %s1936_s19 }
 0x19a   : > { %p19_p5 = scmp.ge.s32.totalorder %s22_s23, 4   ;;  %s2442_s19 = smov %s1940_s20 }
 0x19b   : > { %s2443_s20 = smov %s2044_s30  ;;  %s2444_s21 = smov %s1948_s22 }
 0x19c   : > { %s2445_s22 = smov %s2447_s26  ;;  %21 = sbr.rel (!%p19_p5) target bundleno = 8 (0x8), region = 160 }
 0x1a3   :  { %1410 = vsyncpa [#allocation4], 1 }
 0x1a4   :  { %1412 = vsyncpa [#allocation4 + $0x1], 1 }
 0x1a5   :  { %1413 = vsyncpa [#allocation6], 1 }
 0x1a6   :  { %1415 = vsyncpa [#allocation6 + $0x1], 1 }

</bundles_post_ra>
